<compile_context>
chip_gen: v7x
topology: tpu7x:2x2x1
jax: 0.10.0
libtpu: 0.0.40
codegen_flags: <defaults>
</compile_context>

<pallas_src>
import jax
import jax.numpy as jnp
from jax.experimental import pallas as pl
from jax.experimental.pallas import tpu as pltpu


NEG_SLOPE = 0.01   # F.leaky_relu default
LANE = 128         # lane-dense feature padding target
SUB = 16           # sublane padding (bf16 packs 16 rows / vreg)


def _round_up(v, m):
    return ((v + m - 1) // m) * m


def encoder_kernel(idx_gather_ref, dst_row_ref, x_ref, ea_ref, w_ref, b_ref, o_ref):
    """Fused 3-layer Encoder.

    Per layer (SpatialBasicBlock, aggr='add', batch_norm=False):
      out[n] = sum_{e: dst[e]==n} leaky_relu(x[dst[e]]@Wi + x[src[e]]@Wj + ea[e]@We + b)
               + x[n] @ W_up + b_up
    """
    E = ea_ref.shape[0]
    N = x_ref.shape[0]

    # ---- prologue: edge-index dependent operators + edge projections, built once ----
    # Stacked gather one-hot [2E, 2N]: rows 0:E select column dst[e] (block 0 = x@Wi),
    # rows E:2E select column N+src[e] (block 1 = x@Wj).  Padded edges carry -1 -> zero rows.
    col_ids = jax.lax.broadcasted_iota(jnp.int32, (2 * E, 2 * N), 1)
    oh_gather = (col_ids == idx_gather_ref[...]).astype(jnp.bfloat16)        # [2E, 2N]
    # Scatter-add one-hot (aggr='add'), built directly as [N, E] (transpose-free);
    # padded edges (dst = -1) give all-zero columns -> their messages are dropped.
    row_ids = jax.lax.broadcasted_iota(jnp.int32, (N, E), 0)
    scat_dst = (row_ids == dst_row_ref[...]).astype(jnp.bfloat16)            # [N, E]

    ea_bf = ea_ref[...].astype(jnp.bfloat16)                                 # [E, 128]
    # All three layers' edge projections in one matmul: ea @ [We1 | We2 | We3].
    ea_we = jnp.dot(ea_bf, w_ref[0:LANE, :],
                    preferred_element_type=jnp.float32)                      # [E, 384] f32

    def block(h_f32, layer):
        x_bf = h_f32.astype(jnp.bfloat16)                                    # [N, 128]
        w_x = w_ref[LANE * (layer + 1):LANE * (layer + 2), :]                # [128, 384] bf16
        # One K=128 matmul projects x through Wi | Wj | Wup (128-lane blocks).
        proj = jnp.dot(x_bf, w_x, preferred_element_type=jnp.float32)        # [N, 384] f32
        up = proj[:, 2 * LANE:3 * LANE] + b_ref[3 + layer:4 + layer, :]      # upsample branch
        # One stacked gather matmul: [2E,2N] @ [x@Wi ; x@Wj]  -> rows 0:E = (x@Wi)[dst],
        # rows E:2E = (x@Wj)[src].  Exact selection (one-hot is 0/1).
        gath_rhs = jnp.concatenate([proj[:, 0:LANE], proj[:, LANE:2 * LANE]],
                                   axis=0).astype(jnp.bfloat16)              # [2N, 128]
        g = jnp.dot(oh_gather, gath_rhs, preferred_element_type=jnp.float32) # [2E, 128]
        pre = (g[0:E, :] + g[E:2 * E, :]
               + ea_we[:, LANE * layer:LANE * (layer + 1)]
               + b_ref[layer:layer + 1, :])                                  # [E, 128] f32
        msg = jnp.maximum(pre, NEG_SLOPE * pre)                              # leaky_relu (VPU)
        # Scatter-add messages to destination nodes.
        agg = jnp.dot(scat_dst, msg.astype(jnp.bfloat16),
                      preferred_element_type=jnp.float32)                    # [N, 128]
        return agg + up

    h = block(x_ref[...], 0)
    h = block(h, 1)
    h = block(h, 2)
    o_ref[...] = h.astype(o_ref.dtype)


def init_linear(key, in_f, out_f):
    """Deterministic init mimicking nn.Linear defaults (uniform +- 1/sqrt(fan_in))."""
    k_w, k_b = jax.random.split(key)
    bound = 1.0 / (in_f ** 0.5)
    w = jax.random.uniform(k_w, (out_f, in_f), jnp.float32, -bound, bound)
    b = jax.random.uniform(k_b, (out_f,), jnp.float32, -bound, bound)
    return w, b


def init_encoder_params(key, channels, dim):
    """Pack all 6 Linear layers of the Encoder into two lane-dense slabs.

    Returns:
      w_slab: bf16 [4*LANE, 3*LANE].
        rows 0:LANE                      -> [We_1 | We_2 | We_3]     (edge weights, per-layer lane block)
        rows (l+1)*LANE:(l+2)*LANE       -> [Wi_l | Wj_l | Wup_l]    (node weights of layer l)
      b_slab: f32 [8, LANE].  rows 0-2: message biases, rows 3-5: upsample biases.
    Column split of nn.Linear(2*in+edge, out): [:in] = x_i (dst), [in:2in] = x_j (src), [2in:] = edge_attr.
    """
    specs = [(channels, 16), (16, 32), (32, 64)]
    w_slab = jnp.zeros((4 * LANE, 3 * LANE), jnp.float32)
    b_slab = jnp.zeros((8, LANE), jnp.float32)
    for l, ((in_ch, out_ch), k) in enumerate(zip(specs, jax.random.split(key, 3))):
        k_lin, k_up = jax.random.split(k)
        w_lin, b_lin = init_linear(k_lin, 2 * in_ch + dim, out_ch)   # [out, 2*in+edge]
        w_up, b_up = init_linear(k_up, in_ch, out_ch)                # [out, in]
        col = l * LANE
        # Edge-attr weight -> rows 0:LANE, lane block l.
        w_slab = w_slab.at[0:dim, col:col + out_ch].set(w_lin[:, 2 * in_ch:].T)
        r = (l + 1) * LANE
        w_slab = w_slab.at[r:r + in_ch, 0:out_ch].set(w_lin[:, :in_ch].T)                      # Wi (x_i = x[dst])
        w_slab = w_slab.at[r:r + in_ch, LANE:LANE + out_ch].set(w_lin[:, in_ch:2 * in_ch].T)   # Wj (x_j = x[src])
        w_slab = w_slab.at[r:r + in_ch, 2 * LANE:2 * LANE + out_ch].set(w_up.T)                # Wup
        b_slab = b_slab.at[l, :out_ch].set(b_lin)
        b_slab = b_slab.at[3 + l, :out_ch].set(b_up)
    return w_slab.astype(jnp.bfloat16), b_slab


def encoder_forward(x, edge_index, edge_attr, w_slab, b_slab, out_ch_final=64):
    """Encoder forward: conv1 (channels->16), conv2 (16->32), conv3 (32->64), fused."""
    n_nodes, f_in = x.shape
    n_edges, d_edge = edge_attr.shape
    n_pad = _round_up(max(n_nodes, 8), SUB)
    e_pad = _round_up(max(n_edges, 8), SUB)

    # Lane-dense, zero-padded inputs.
    x_pad = jnp.zeros((n_pad, LANE), jnp.float32).at[:n_nodes, :f_in].set(x)
    ea_pad = jnp.zeros((e_pad, LANE), jnp.float32).at[:n_edges, :d_edge].set(edge_attr)

    src = edge_index[0].astype(jnp.int32)
    dst = edge_index[1].astype(jnp.int32)
    fill = jnp.full((e_pad,), -1, jnp.int32)               # padded edges match no node
    dst_p = fill.at[:n_edges].set(dst)
    src_off_p = fill.at[:n_edges].set(src + n_pad)         # src block lives at columns [N, 2N)
    idx_gather = jnp.concatenate([dst_p, src_off_p], axis=0).reshape(2 * e_pad, 1)
    dst_row = dst_p.reshape(1, e_pad)                      # pre-transposed row for scatter one-hot

    # Advisory cost estimate.
    flops = (3 * (2 * n_pad * LANE * (3 * LANE)            # per-layer x projection
                  + 2 * (2 * e_pad) * (2 * n_pad) * LANE   # stacked gather
                  + 2 * n_pad * e_pad * LANE)              # scatter-add
             + 2 * e_pad * LANE * (3 * LANE))              # hoisted edge projections
    bytes_acc = (x_pad.size * 4 + ea_pad.size * 4
                 + idx_gather.size * 4 + dst_row.size * 4
                 + int(w_slab.size) * 2 + int(b_slab.size) * 4
                 + n_pad * LANE * 4)
    cost = pl.CostEstimate(flops=int(flops), transcendentals=0, bytes_accessed=int(bytes_acc))

    vmem = pl.BlockSpec(memory_space=pltpu.MemorySpace.VMEM)
    out_pad = pl.pallas_call(
        encoder_kernel,
        out_shape=jax.ShapeDtypeStruct((n_pad, LANE), jnp.float32),
        in_specs=[vmem] * 6,
        out_specs=vmem,
        cost_estimate=cost,
    )(idx_gather, dst_row, x_pad, ea_pad, w_slab, b_slab)

    return out_pad[:n_nodes, :out_ch_final]


if __name__ == "__main__":
    # Small synthetic graph: 8 nodes, 16 edges, 4 node features, 3 edge features.
    channels, dim = 4, 3
    num_nodes, num_edges = 8, 16

    key = jax.random.PRNGKey(0)
    k_x, k_ea, k_ei, k_params = jax.random.split(key, 4)

    x = jax.random.normal(k_x, (num_nodes, channels), jnp.float32)
    edge_attr = jax.random.normal(k_ea, (num_edges, dim), jnp.float32)
    edge_index = jax.random.randint(k_ei, (2, num_edges), 0, num_nodes, jnp.int32)

    w_slab, b_slab = init_encoder_params(k_params, channels, dim)

    out = encoder_forward(x, edge_index, edge_attr, w_slab, b_slab, out_ch_final=64)
    out = jax.block_until_ready(out)
    assert out.shape == (num_nodes, 64), out.shape
    print("KERNEL_OK")
</pallas_src>

<mosaic_0001>
module attributes {stable_mosaic.version = 11 : i64} {
  func.func @encoder_kernel(%arg0: memref<32x1xi32, #tpu.memory_space<vmem>>, %arg1: memref<1x16xi32, #tpu.memory_space<vmem>>, %arg2: memref<16x128xf32, #tpu.memory_space<vmem>>, %arg3: memref<16x128xf32, #tpu.memory_space<vmem>>, %arg4: memref<512x384xbf16, #tpu.memory_space<vmem>>, %arg5: memref<8x128xf32, #tpu.memory_space<vmem>>, %arg6: memref<16x128xf32, #tpu.memory_space<vmem>>) attributes {dimension_semantics = [], scalar_prefetch = 0 : i64, scratch_operands = 0 : i64, tpu.core_type = #tpu.core_type<tc>} {
    %0 = tpu.iota {dimensions = array<i32: 1>} : vector<32x32xi32>
    %c0 = arith.constant 0 : index
    %c0_0 = arith.constant 0 : index
    %1 = vector.load %arg0[%c0, %c0_0] : memref<32x1xi32, #tpu.memory_space<vmem>>, vector<32x1xi32>
    %2 = vector.broadcast %1 : vector<32x1xi32> to vector<32x32xi32>
    %3 = arith.cmpi eq, %0, %2 : vector<32x32xi32>
    %4 = arith.extui %3 : vector<32x32xi1> to vector<32x32xi32>
    %5 = arith.sitofp %4 : vector<32x32xi32> to vector<32x32xf32>
    %6 = arith.truncf %5 : vector<32x32xf32> to vector<32x32xbf16>
    %7 = tpu.iota {dimensions = array<i32: 0>} : vector<16x16xi32>
    %c0_1 = arith.constant 0 : index
    %c0_2 = arith.constant 0 : index
    %8 = vector.load %arg1[%c0_1, %c0_2] : memref<1x16xi32, #tpu.memory_space<vmem>>, vector<1x16xi32>
    %9 = vector.broadcast %8 : vector<1x16xi32> to vector<16x16xi32>
    %10 = arith.cmpi eq, %7, %9 : vector<16x16xi32>
    %11 = arith.extui %10 : vector<16x16xi1> to vector<16x16xi32>
    %12 = arith.sitofp %11 : vector<16x16xi32> to vector<16x16xf32>
    %13 = arith.truncf %12 : vector<16x16xf32> to vector<16x16xbf16>
    %c0_3 = arith.constant 0 : index
    %c0_4 = arith.constant 0 : index
    %14 = vector.load %arg3[%c0_3, %c0_4] : memref<16x128xf32, #tpu.memory_space<vmem>>, vector<16x128xf32>
    %15 = arith.truncf %14 : vector<16x128xf32> to vector<16x128xbf16>
    %c0_5 = arith.constant 0 : index
    %c0_6 = arith.constant 0 : index
    %16 = vector.load %arg4[%c0_5, %c0_6] : memref<512x384xbf16, #tpu.memory_space<vmem>>, vector<128x384xbf16>
    %cst = arith.constant dense<0.000000e+00> : vector<16x384xf32>
    %17 = tpu.matmul %15, %16, %cst {dimension_numbers = #tpu.dot_dimension_numbers<[1], [0], [0], [1], [0, 0, 1, 1], [], []>} : vector<16x128xbf16>, vector<128x384xbf16>, vector<16x384xf32> -> vector<16x384xf32>
    %c0_7 = arith.constant 0 : index
    %c0_8 = arith.constant 0 : index
    %18 = vector.load %arg2[%c0_7, %c0_8] : memref<16x128xf32, #tpu.memory_space<vmem>>, vector<16x128xf32>
    %19 = arith.truncf %18 : vector<16x128xf32> to vector<16x128xbf16>
    %c128 = arith.constant 128 : index
    %c0_9 = arith.constant 0 : index
    %20 = vector.load %arg4[%c128, %c0_9] : memref<512x384xbf16, #tpu.memory_space<vmem>>, vector<128x384xbf16>
    %cst_10 = arith.constant dense<0.000000e+00> : vector<16x384xf32>
    %21 = tpu.matmul %19, %20, %cst_10 {dimension_numbers = #tpu.dot_dimension_numbers<[1], [0], [0], [1], [0, 0, 1, 1], [], []>} : vector<16x128xbf16>, vector<128x384xbf16>, vector<16x384xf32> -> vector<16x384xf32>
    %22 = vector.extract_strided_slice %21 {offsets = [0, 256], sizes = [16, 128], strides = [1, 1]} : vector<16x384xf32> to vector<16x128xf32>
    %c3 = arith.constant 3 : index
    %c0_11 = arith.constant 0 : index
    %23 = vector.load %arg5[%c3, %c0_11] : memref<8x128xf32, #tpu.memory_space<vmem>>, vector<1x128xf32>
    %24 = vector.broadcast %23 : vector<1x128xf32> to vector<16x128xf32>
    %25 = arith.addf %22, %24 : vector<16x128xf32>
    %26 = vector.extract_strided_slice %21 {offsets = [0, 0], sizes = [16, 128], strides = [1, 1]} : vector<16x384xf32> to vector<16x128xf32>
    %27 = vector.extract_strided_slice %21 {offsets = [0, 128], sizes = [16, 128], strides = [1, 1]} : vector<16x384xf32> to vector<16x128xf32>
    %28 = tpu.concatenate %26, %27 in 0 : vector<16x128xf32>, vector<16x128xf32> -> vector<32x128xf32>
    %29 = arith.truncf %28 : vector<32x128xf32> to vector<32x128xbf16>
    %cst_12 = arith.constant dense<0.000000e+00> : vector<32x128xf32>
    %30 = tpu.matmul %6, %29, %cst_12 {dimension_numbers = #tpu.dot_dimension_numbers<[1], [0], [0], [1], [0, 0, 1, 1], [], []>} : vector<32x32xbf16>, vector<32x128xbf16>, vector<32x128xf32> -> vector<32x128xf32>
    %31 = vector.extract_strided_slice %30 {offsets = [0, 0], sizes = [16, 128], strides = [1, 1]} : vector<32x128xf32> to vector<16x128xf32>
    %32 = vector.extract_strided_slice %30 {offsets = [16, 0], sizes = [16, 128], strides = [1, 1]} : vector<32x128xf32> to vector<16x128xf32>
    %33 = arith.addf %31, %32 : vector<16x128xf32>
    %34 = vector.extract_strided_slice %17 {offsets = [0, 0], sizes = [16, 128], strides = [1, 1]} : vector<16x384xf32> to vector<16x128xf32>
    %35 = arith.addf %33, %34 : vector<16x128xf32>
    %c0_13 = arith.constant 0 : index
    %c0_14 = arith.constant 0 : index
    %36 = vector.load %arg5[%c0_13, %c0_14] : memref<8x128xf32, #tpu.memory_space<vmem>>, vector<1x128xf32>
    %37 = vector.broadcast %36 : vector<1x128xf32> to vector<16x128xf32>
    %38 = arith.addf %35, %37 : vector<16x128xf32>
    %cst_15 = arith.constant 0.00999999977 : f32
    %39 = vector.broadcast %cst_15 : f32 to vector<16x128xf32>
    %40 = arith.mulf %39, %38 : vector<16x128xf32>
    %41 = arith.maximumf %38, %40 : vector<16x128xf32>
    %42 = arith.truncf %41 : vector<16x128xf32> to vector<16x128xbf16>
    %cst_16 = arith.constant dense<0.000000e+00> : vector<16x128xf32>
    %43 = tpu.matmul %13, %42, %cst_16 {dimension_numbers = #tpu.dot_dimension_numbers<[1], [0], [0], [1], [0, 0, 1, 1], [], []>} : vector<16x16xbf16>, vector<16x128xbf16>, vector<16x128xf32> -> vector<16x128xf32>
    %44 = arith.addf %43, %25 : vector<16x128xf32>
    %45 = arith.truncf %44 : vector<16x128xf32> to vector<16x128xbf16>
    %c256 = arith.constant 256 : index
    %c0_17 = arith.constant 0 : index
    %46 = vector.load %arg4[%c256, %c0_17] : memref<512x384xbf16, #tpu.memory_space<vmem>>, vector<128x384xbf16>
    %cst_18 = arith.constant dense<0.000000e+00> : vector<16x384xf32>
    %47 = tpu.matmul %45, %46, %cst_18 {dimension_numbers = #tpu.dot_dimension_numbers<[1], [0], [0], [1], [0, 0, 1, 1], [], []>} : vector<16x128xbf16>, vector<128x384xbf16>, vector<16x384xf32> -> vector<16x384xf32>
    %48 = vector.extract_strided_slice %47 {offsets = [0, 256], sizes = [16, 128], strides = [1, 1]} : vector<16x384xf32> to vector<16x128xf32>
    %c4 = arith.constant 4 : index
    %c0_19 = arith.constant 0 : index
    %49 = vector.load %arg5[%c4, %c0_19] : memref<8x128xf32, #tpu.memory_space<vmem>>, vector<1x128xf32>
    %50 = vector.broadcast %49 : vector<1x128xf32> to vector<16x128xf32>
    %51 = arith.addf %48, %50 : vector<16x128xf32>
    %52 = vector.extract_strided_slice %47 {offsets = [0, 0], sizes = [16, 128], strides = [1, 1]} : vector<16x384xf32> to vector<16x128xf32>
    %53 = vector.extract_strided_slice %47 {offsets = [0, 128], sizes = [16, 128], strides = [1, 1]} : vector<16x384xf32> to vector<16x128xf32>
    %54 = tpu.concatenate %52, %53 in 0 : vector<16x128xf32>, vector<16x128xf32> -> vector<32x128xf32>
    %55 = arith.truncf %54 : vector<32x128xf32> to vector<32x128xbf16>
    %cst_20 = arith.constant dense<0.000000e+00> : vector<32x128xf32>
    %56 = tpu.matmul %6, %55, %cst_20 {dimension_numbers = #tpu.dot_dimension_numbers<[1], [0], [0], [1], [0, 0, 1, 1], [], []>} : vector<32x32xbf16>, vector<32x128xbf16>, vector<32x128xf32> -> vector<32x128xf32>
    %57 = vector.extract_strided_slice %56 {offsets = [0, 0], sizes = [16, 128], strides = [1, 1]} : vector<32x128xf32> to vector<16x128xf32>
    %58 = vector.extract_strided_slice %56 {offsets = [16, 0], sizes = [16, 128], strides = [1, 1]} : vector<32x128xf32> to vector<16x128xf32>
    %59 = arith.addf %57, %58 : vector<16x128xf32>
    %60 = vector.extract_strided_slice %17 {offsets = [0, 128], sizes = [16, 128], strides = [1, 1]} : vector<16x384xf32> to vector<16x128xf32>
    %61 = arith.addf %59, %60 : vector<16x128xf32>
    %c1 = arith.constant 1 : index
    %c0_21 = arith.constant 0 : index
    %62 = vector.load %arg5[%c1, %c0_21] : memref<8x128xf32, #tpu.memory_space<vmem>>, vector<1x128xf32>
    %63 = vector.broadcast %62 : vector<1x128xf32> to vector<16x128xf32>
    %64 = arith.addf %61, %63 : vector<16x128xf32>
    %cst_22 = arith.constant 0.00999999977 : f32
    %65 = vector.broadcast %cst_22 : f32 to vector<16x128xf32>
    %66 = arith.mulf %65, %64 : vector<16x128xf32>
    %67 = arith.maximumf %64, %66 : vector<16x128xf32>
    %68 = arith.truncf %67 : vector<16x128xf32> to vector<16x128xbf16>
    %cst_23 = arith.constant dense<0.000000e+00> : vector<16x128xf32>
    %69 = tpu.matmul %13, %68, %cst_23 {dimension_numbers = #tpu.dot_dimension_numbers<[1], [0], [0], [1], [0, 0, 1, 1], [], []>} : vector<16x16xbf16>, vector<16x128xbf16>, vector<16x128xf32> -> vector<16x128xf32>
    %70 = arith.addf %69, %51 : vector<16x128xf32>
    %71 = arith.truncf %70 : vector<16x128xf32> to vector<16x128xbf16>
    %c384 = arith.constant 384 : index
    %c0_24 = arith.constant 0 : index
    %72 = vector.load %arg4[%c384, %c0_24] : memref<512x384xbf16, #tpu.memory_space<vmem>>, vector<128x384xbf16>
    %cst_25 = arith.constant dense<0.000000e+00> : vector<16x384xf32>
    %73 = tpu.matmul %71, %72, %cst_25 {dimension_numbers = #tpu.dot_dimension_numbers<[1], [0], [0], [1], [0, 0, 1, 1], [], []>} : vector<16x128xbf16>, vector<128x384xbf16>, vector<16x384xf32> -> vector<16x384xf32>
    %74 = vector.extract_strided_slice %73 {offsets = [0, 256], sizes = [16, 128], strides = [1, 1]} : vector<16x384xf32> to vector<16x128xf32>
    %c5 = arith.constant 5 : index
    %c0_26 = arith.constant 0 : index
    %75 = vector.load %arg5[%c5, %c0_26] : memref<8x128xf32, #tpu.memory_space<vmem>>, vector<1x128xf32>
    %76 = vector.broadcast %75 : vector<1x128xf32> to vector<16x128xf32>
    %77 = arith.addf %74, %76 : vector<16x128xf32>
    %78 = vector.extract_strided_slice %73 {offsets = [0, 0], sizes = [16, 128], strides = [1, 1]} : vector<16x384xf32> to vector<16x128xf32>
    %79 = vector.extract_strided_slice %73 {offsets = [0, 128], sizes = [16, 128], strides = [1, 1]} : vector<16x384xf32> to vector<16x128xf32>
    %80 = tpu.concatenate %78, %79 in 0 : vector<16x128xf32>, vector<16x128xf32> -> vector<32x128xf32>
    %81 = arith.truncf %80 : vector<32x128xf32> to vector<32x128xbf16>
    %cst_27 = arith.constant dense<0.000000e+00> : vector<32x128xf32>
    %82 = tpu.matmul %6, %81, %cst_27 {dimension_numbers = #tpu.dot_dimension_numbers<[1], [0], [0], [1], [0, 0, 1, 1], [], []>} : vector<32x32xbf16>, vector<32x128xbf16>, vector<32x128xf32> -> vector<32x128xf32>
    %83 = vector.extract_strided_slice %82 {offsets = [0, 0], sizes = [16, 128], strides = [1, 1]} : vector<32x128xf32> to vector<16x128xf32>
    %84 = vector.extract_strided_slice %82 {offsets = [16, 0], sizes = [16, 128], strides = [1, 1]} : vector<32x128xf32> to vector<16x128xf32>
    %85 = arith.addf %83, %84 : vector<16x128xf32>
    %86 = vector.extract_strided_slice %17 {offsets = [0, 256], sizes = [16, 128], strides = [1, 1]} : vector<16x384xf32> to vector<16x128xf32>
    %87 = arith.addf %85, %86 : vector<16x128xf32>
    %c2 = arith.constant 2 : index
    %c0_28 = arith.constant 0 : index
    %88 = vector.load %arg5[%c2, %c0_28] : memref<8x128xf32, #tpu.memory_space<vmem>>, vector<1x128xf32>
    %89 = vector.broadcast %88 : vector<1x128xf32> to vector<16x128xf32>
    %90 = arith.addf %87, %89 : vector<16x128xf32>
    %cst_29 = arith.constant 0.00999999977 : f32
    %91 = vector.broadcast %cst_29 : f32 to vector<16x128xf32>
    %92 = arith.mulf %91, %90 : vector<16x128xf32>
    %93 = arith.maximumf %90, %92 : vector<16x128xf32>
    %94 = arith.truncf %93 : vector<16x128xf32> to vector<16x128xbf16>
    %cst_30 = arith.constant dense<0.000000e+00> : vector<16x128xf32>
    %95 = tpu.matmul %13, %94, %cst_30 {dimension_numbers = #tpu.dot_dimension_numbers<[1], [0], [0], [1], [0, 0, 1, 1], [], []>} : vector<16x16xbf16>, vector<16x128xbf16>, vector<16x128xf32> -> vector<16x128xf32>
    %96 = arith.addf %95, %77 : vector<16x128xf32>
    %c0_31 = arith.constant 0 : index
    %c0_32 = arith.constant 0 : index
    %97 = vector.load %arg6[%c0_31, %c0_32] : memref<16x128xf32, #tpu.memory_space<vmem>>, vector<16x128xf32>
    tpu.vector_store %arg6[%c0_31, %c0_32], %96 {strides = array<i32>} : memref<16x128xf32, #tpu.memory_space<vmem>>, vector<16x128xf32>,
    return
  }
}

</mosaic_0001>

<bundles_post_ra>
// kernel: tpu_custom_call.1
= control target key start
LH: loop header
LB: loop body
LE: loop exit
PB: predicated region body
PF: predicated region fallthrough
CT: control target
= control target key end

     0   :  { %11 = vsyncpa [#allocation3], 0  ;;  %s2231_s0 = inlined_call_operand.vmem [shape: s32[32,1], index: 0, kind: input, shape index: {}]   ;;  %s2232_s1 = inlined_call_operand.hbm [shape: s32[1,16], index: 1, kind: input, shape index: {}]   ;;  %s2233_s2 = inlined_call_operand.vmem [shape: f32[16,128], index: 2, kind: input, shape index: {}]   ;;  %s2234_s3 = inlined_call_operand.vmem [shape: f32[16,128], index: 3, kind: input, shape index: {}]   ;;  %s2235_s4 = inlined_call_operand.hbm [shape: bf16[512,384], index: 4, kind: input, shape index: {}]   ;;  %s2236_s5 = inlined_call_operand.vmem [shape: f32[8,128], index: 5, kind: input, shape index: {}]   ;;  %s2237_s6 = inlined_call_operand.hbm [shape: f32[16,128], index: 6, kind: output, shape index: {}]  }
   0x1   :  { %12 = vsyncpa [#allocation6], 0 }
   0x2   :  { %13 = vsyncpa [#allocation4], 0  ;;  %s1982_s21 = smov [#allocation2]   ;;  %s1983_s23 = smov [#allocation5]  }
   0x3   :  { %s22_s22 = sshll.u32 %s1982_s21, 4  ;;  %s35_s24 = sshll.u32 %s1983_s23, 4  ;;  %s23_s22 = int_to_ptr.vmem [resolvable:$true] %s22_s22  ;;  %s2027_s24 = int_to_ptr.vmem [resolvable:$true] %s35_s24 }
   0x4   :  { %s1910_s27 = scalar_lea.hbm %s2232_s1, 16 }
   0x5   :  { %p1911_p0 = scmp.ne.s32.totalorder %s2232_s1, %s1910_s27  ;;  %p1914_p1 = scmp.lt.u32.totalorder %s1910_s27, %s2232_s1 }
   0x7   :  { %p1916_p2 = pnand %p1914_p1, %p1911_p0 }
   0x9   :  { %1919 = shalt.err (!%p1916_p2)
}
   0xa   :  { %s1920_s8 = scalar_lea.vmem %s23_s22, 16  ;;  %s1924_s9 = scalar_lea.vmem %s23_s22, 32 }
   0xb   :  { %p1921_p3 = scmp.ne.s32.totalorder %s23_s22, %s1920_s8  ;;  %p1925_p4 = scmp.lt.s32.totalorder %s23_s22, %s23_s22 }
   0xc   :  { %p1926_p5 = scmp.lt.s32.totalorder %s1924_s9, %s1920_s8 }
   0xe   :  { %p1927_p6 = por %p1926_p5, %p1925_p4 }
  0x10   :  { %p1928_p7 = pnand %p1927_p6, %p1921_p3 }
  0x12   :  { %1931 = shalt.err (!%p1928_p7)
}
  0x13   :  { %25 = dma.hbm_to_vmem [thread:$0]  %s2232_s1, 16, %s23_s22, [#allocation3]  }
  0x14   :  { %s1932_s14 = scalar_lea.hbm %s2235_s4, 12288 }
  0x15   :  { %p1933_p8 = scmp.ne.s32.totalorder %s2235_s4, %s1932_s14  ;;  %p1936_p9 = scmp.lt.u32.totalorder %s1932_s14, %s2235_s4 }
  0x17   :  { %p1938_p10 = pnand %p1936_p9, %p1933_p8 }
  0x19   :  { %1941 = shalt.err (!%p1938_p10)
}
  0x1a   :  { %s1942_s19 = scalar_lea.vmem %s2027_s24, 12288  ;;  %p1947_p12 = scmp.lt.s32.totalorder %s2027_s24, %s2027_s24 }
  0x1b   :  { %p1943_p11 = scmp.ne.s32.totalorder %s2027_s24, %s1942_s19  ;;  %p1948_p13 = scmp.lt.s32.totalorder %s1942_s19, %s1942_s19 }
  0x1d   :  { %p1949_p0 = por %p1948_p13, %p1947_p12 }
  0x1f   :  { %p1950_p1 = pnand %p1949_p0, %p1943_p11 }
  0x21   :  { %1953 = shalt.err (!%p1950_p1)
}
  0x22   :  { %s1984_s1 = smov 192   ;;  %s1985_s20 = smov 12  }
  0x23   :  { %41 = dma.hbm_to_vmem [thread:$0]  %s2235_s4, 12288, %s2027_s24, [#allocation6], %s1984_s1, %s1984_s1, %s1985_s20  }
  0x24   :  { %1976 = dma.done.wait [#allocation3], 16  }
  0x25   :  { %1977 = vsyncadd [#allocation3], 4294967280 }
  0x26   :  { %1978 = dma.done.wait [#allocation6], 12288  }
  0x27   :  { %1979 = vsyncadd [#allocation6], 4294955008  ;;  %v1986_v0 = vmov 0   ;;  %v1782_v1 = vld [vmem:[#allocation5 + $0x4] ss:$12 sps:$4 sm:$0xff]   ;;  %v53_v16 = vld [vmem:[%s2231_s0] sm:$0xff]  ;;  %v51_v44 = vlaneseq }
  0x28   :  { %293 = vmatprep.mubr.bf16.mxu0 %v1986_v0  ;;  %1780 = vset.pattern.permute.xlu0 %v1986_v0  ;;  %v1784_v2 = vld [vmem:[#allocation5] ss:$12 sps:$4 sm:$0xff]   ;;  %v1785_v3 = vld [vmem:[#allocation5 + $0x1c] ss:$12 sps:$4 sm:$0xff]   ;;  %v1787_v4 = vld [vmem:[#allocation5 + $0x18] ss:$12 sps:$4 sm:$0xff]  }
  0x29   :  { %1781 = vset.pattern.permute.xlu1 %v1986_v0  ;;  %261 = vmatprep.subr.bf16.mxu0 %v1782_v1  ;;  %v1788_v5 = vld [vmem:[#allocation5 + $0x34] ss:$12 sps:$4 sm:$0xff]   ;;  %v1790_v6 = vld [vmem:[#allocation5 + $0x30] ss:$12 sps:$4 sm:$0xff]   ;;  %v1791_v7 = vld [vmem:[#allocation5 + $0x4c] ss:$12 sps:$4 sm:$0xff]  }
  0x2a   :  { %262 = vmatpush1.bf16.msra.mxu0 %v1784_v2  ;;  %v1793_v8 = vld [vmem:[#allocation5 + $0x48] ss:$12 sps:$4 sm:$0xff]   ;;  %v1794_v9 = vld [vmem:[#allocation5 + $0x64] ss:$12 sps:$4 sm:$0xff]   ;;  %v1796_v10 = vld [vmem:[#allocation5 + $0x60] ss:$12 sps:$4 sm:$0xff]   ;;  %58 = vperm.xlu0 %1780, %v53_v16  }
  0x2b   :  { %263 = vmatprep.subr.bf16.mxu0 %v1785_v3  ;;  %v1797_v11 = vld [vmem:[#allocation5 + $0x7c] ss:$12 sps:$4 sm:$0xff]   ;;  %v1799_v12 = vld [vmem:[#allocation5 + $0x78] ss:$12 sps:$4 sm:$0xff]   ;;  %v1800_v13 = vld [vmem:[#allocation5 + $0x94] ss:$12 sps:$4 sm:$0xff]  }
  0x2c   :  { %v1802_v14 = vld [vmem:[#allocation5 + $0x90] ss:$12 sps:$4 sm:$0xff]   ;;  %v1803_v15 = vld [vmem:[#allocation5 + $0xac] ss:$12 sps:$4 sm:$0xff]   ;;  %v1805_v20 = vld [vmem:[#allocation5 + $0xa8] ss:$12 sps:$4 sm:$0xff]  }
  0x2d   :  { %v55_v17 = vld [vmem:[%s2231_s0 + $0x10] sm:$0xff]  ;;  %v54_v18 = vld [vmem:[%s2231_s0 + $0x8] sm:$0xff]  ;;  %v56_v19 = vld [vmem:[%s2231_s0 + $0x18] sm:$0xff]  ;;  %v1987_v43 = vmov 0.0   ;;  %v2094_v45 = vand.u32 127, %v51_v44  ;;  %vm601_vm2 = vcmask 261120  }
  0x2e   :  { %264 = vmatpush1.bf16.msra.mxu0 %v1787_v4  ;;  %64 = vperm.xlu1 %1781, %v55_v17   ;;  %v98_v21 = vld [vmem:[%s2234_s3] sm:$0xff]  ;;  %v99_v22 = vld [vmem:[%s2234_s3 + $0x8] sm:$0xff]  ;;  %vm1988_vm3 = vmmov 0   ;;  %vm673_vm8 = vcmask 130048   ;;  %s1989_s22 = smov [#allocation7]  }
  0x2f   :  { %265 = vmatprep.subr.bf16.mxu0 %v1788_v5  ;;  %v1808_v23 = vld [vmem:[#allocation5 + $0xc4] ss:$12 sps:$4 sm:$0xff]   ;;  %61 = vperm.xlu0 %1780, %v54_v18   ;;  %v1806_v24 = vld [vmem:[#allocation5 + $0xc0] ss:$12 sps:$4 sm:$0xff]   ;;  %v2079_v25 = vpack.c.bf16 %v99_v22, %v98_v21  ;;  %v1811_v26 = vld [vmem:[#allocation5 + $0xdc] ss:$12 sps:$4 sm:$0xff]  }
  0x30   :  { %v1809_v27 = vld [vmem:[#allocation5 + $0xd8] ss:$12 sps:$4 sm:$0xff]   ;;  %v1814_v28 = vld [vmem:[#allocation5 + $0xf4] ss:$12 sps:$4 sm:$0xff]   ;;  %v1812_v29 = vld [vmem:[#allocation5 + $0xf0] ss:$12 sps:$4 sm:$0xff]   ;;  %1630 = vmatprep.subr.bf16.mxu1 %v1987_v43  ;;  %1646 = vmatprep.mubr.msk.bf16.mxu1 %vm1988_vm3, %v1987_v43 }
  0x31   :  { %v1817_v30 = vld [vmem:[#allocation5 + $0x10c] ss:$12 sps:$4 sm:$0xff]   ;;  %v1815_v31 = vld [vmem:[#allocation5 + $0x108] ss:$12 sps:$4 sm:$0xff]   ;;  %v1820_v32 = vld [vmem:[#allocation5 + $0x124] ss:$12 sps:$4 sm:$0xff]  }
  0x32   :  { %266 = vmatpush1.bf16.msra.mxu0 %v1790_v6  ;;  %67 = vperm.xlu1 %1781, %v56_v19   ;;  %v1818_v33 = vld [vmem:[#allocation5 + $0x120] ss:$12 sps:$4 sm:$0xff]   ;;  %v1823_v34 = vld [vmem:[#allocation5 + $0x13c] ss:$12 sps:$4 sm:$0xff]   ;;  %v1821_v35 = vld [vmem:[#allocation5 + $0x138] ss:$12 sps:$4 sm:$0xff]  }
  0x33   :  { %267 = vmatprep.subr.bf16.mxu0 %v1791_v7  ;;  %v1826_v36 = vld [vmem:[#allocation5 + $0x154] ss:$12 sps:$4 sm:$0xff]   ;;  %v1824_v37 = vld [vmem:[#allocation5 + $0x150] ss:$12 sps:$4 sm:$0xff]   ;;  %v1829_v38 = vld [vmem:[#allocation5 + $0x16c] ss:$12 sps:$4 sm:$0xff]  }
  0x34   :  { %v1827_v39 = vld [vmem:[#allocation5 + $0x168] ss:$12 sps:$4 sm:$0xff]   ;;  %v346_v41 = vld [vmem:[%s2233_s2 + $0x8] sm:$0xff]  ;;  %s1445_s4 = sshll.u32 %s1989_s22, 4  ;;  %s1446_s4 = int_to_ptr.vmem [resolvable:$true] %s1445_s4 }
  0x35   :  { %v345_v40 = vld [vmem:[%s2233_s2] sm:$0xff]  ;;  %v1831_v52 = vld [vmem:[#allocation5 + $0x20] ss:$12 sps:$4 sm:$0xff]   ;;  %s1954_s23 = scalar_lea.vmem %s1446_s4, 256  ;;  %p1959_p3 = scmp.lt.s32.totalorder %s1446_s4, %s1446_s4 }
  0x36   :  { %268 = vmatpush1.bf16.msra.mxu0 %v1793_v8  ;;  %v2089_v42 = vpack.c.bf16 %v346_v41, %v345_v40  ;;  %v1830_v51 = vld [vmem:[#allocation5 + $0x8] ss:$12 sps:$4 sm:$0xff]   ;;  %v1832_v53 = vld [vmem:[#allocation5 + $0x38] ss:$12 sps:$4 sm:$0xff]   ;;  %v1833_v54 = vld [vmem:[#allocation5 + $0x50] ss:$12 sps:$4 sm:$0xff]   ;;  %p1955_p2 = scmp.ne.s32.totalorder %s1446_s4, %s1954_s23  ;;  %p1960_p4 = scmp.lt.s32.totalorder %s1954_s23, %s1954_s23 }
  0x37   :  { %269 = vmatprep.subr.bf16.mxu0 %v1794_v9  ;;  %1631 = vmatpush3.bf16.msra.mxu1 %v1830_v51  ;;  %v1834_v55 = vld [vmem:[#allocation5 + $0x68] ss:$12 sps:$4 sm:$0xff]   ;;  %v1835_v56 = vld [vmem:[#allocation5 + $0x80] ss:$12 sps:$4 sm:$0xff]   ;;  %v1836_v57 = vld [vmem:[#allocation5 + $0x98] ss:$12 sps:$4 sm:$0xff]  }
  0x38   :  { %1632 = vmatprep.subr.bf16.mxu1 %v1987_v43  ;;  %v1837_v58 = vld [vmem:[#allocation5 + $0xb0] ss:$12 sps:$4 sm:$0xff]   ;;  %v1838_v59 = vld [vmem:[#allocation5 + $0xc8] ss:$12 sps:$4 sm:$0xff]   ;;  %v1839_v60 = vld [vmem:[#allocation5 + $0xe0] ss:$12 sps:$4 sm:$0xff]   ;;  %p1961_p5 = por %p1960_p4, %p1959_p3 }
  0x39   :  { %v1840_v61 = vld [vmem:[#allocation5 + $0xf8] ss:$12 sps:$4 sm:$0xff]   ;;  %v1841_v62 = vld [vmem:[#allocation5 + $0x110] ss:$12 sps:$4 sm:$0xff]   ;;  %v1842_v63 = vld [vmem:[#allocation5 + $0x128] ss:$12 sps:$4 sm:$0xff]  }
  0x3a   :  { %270 = vmatpush1.bf16.msra.mxu0 %v1796_v10  ;;  %v1843_v1 = vld [vmem:[#allocation5 + $0x140] ss:$12 sps:$4 sm:$0xff]   ;;  %v1844_v2 = vld [vmem:[#allocation5 + $0x158] ss:$12 sps:$4 sm:$0xff]   ;;  %v1845_v18 = vld [vmem:[#allocation5 + $0x170] ss:$12 sps:$4 sm:$0xff]   ;;  %p1962_p6 = pnand %p1961_p5, %p1955_p2 }
  0x3b   :  { %271 = vmatprep.subr.bf16.mxu0 %v1797_v11  ;;  %1633 = vmatpush3.bf16.msra.mxu1 %v1831_v52  ;;  %v1846_v19 = vld [vmem:[#allocation5 + $0x180] ss:$12 sps:$4 sm:$0xff]   ;;  %v1852_v21 = vld [vmem:[#allocation5 + $0x19c] ss:$12 sps:$4 sm:$0xff]   ;;  %v1850_v22 = vld [vmem:[#allocation5 + $0x198] ss:$12 sps:$4 sm:$0xff]  }
  0x3c   :  { %1634 = vmatprep.subr.bf16.mxu1 %v1987_v43  ;;  %v1462_v52 = vld [vmem:[#allocation2] ss:$0 sm:$0xff] }
  0x3e   :  { %272 = vmatpush1.bf16.msra.mxu0 %v1799_v12 }
  0x3f   :  { %273 = vmatprep.subr.bf16.mxu0 %v1800_v13  ;;  %1635 = vmatpush3.bf16.msra.mxu1 %v1832_v53 }
  0x40   :  { %1636 = vmatprep.subr.bf16.mxu1 %v1987_v43 }
  0x42   :  { %274 = vmatpush1.bf16.msra.mxu0 %v1802_v14 }
  0x43   :  { %275 = vmatprep.subr.bf16.mxu0 %v1803_v15  ;;  %1637 = vmatpush3.bf16.msra.mxu1 %v1833_v54 }
  0x44   :  { %1638 = vmatprep.subr.bf16.mxu1 %v1987_v43 }
  0x46   :  { %276 = vmatpush1.bf16.msra.mxu0 %v1805_v20  ;;  %v1848_v20 = vld [vmem:[#allocation5 + $0x184] ss:$12 sps:$4 sm:$0xff]  }
  0x47   :  { %508 = vmatprep.subr.bf16.mxu0 %v1808_v23  ;;  %1639 = vmatpush3.bf16.msra.mxu1 %v1834_v55  ;;  %v1856_v23 = vld [vmem:[#allocation5 + $0x1b4] ss:$12 sps:$4 sm:$0xff]  }
  0x48   :  { %1640 = vmatprep.subr.bf16.mxu1 %v1987_v43 }
  0x49   :  { %294 = vmatmul.mubr.bf16.vlgmr.msra.gmra.mrb[0].mxu0 %v2079_v25 }
  0x4a   :  { %509 = vmatpush1.bf16.msra.mxu0 %v1806_v24  ;;  %540 = vmatprep.mubr.bf16.mxu0 %v1986_v0  ;;  %v1854_v24 = vld [vmem:[#allocation5 + $0x1b0] ss:$12 sps:$4 sm:$0xff]  }
  0x4b   :  { %510 = vmatprep.subr.bf16.mxu0 %v1811_v26  ;;  %1641 = vmatpush3.bf16.msra.mxu1 %v1835_v56  ;;  %v1858_v26 = vld [vmem:[#allocation5 + $0x1c8] ss:$12 sps:$4 sm:$0xff]  }
  0x4c   :  { %1642 = vmatprep.subr.bf16.mxu1 %v1987_v43 }
  0x4e   :  { %511 = vmatpush1.bf16.msra.mxu0 %v1809_v27  ;;  %v1864_v27 = vld [vmem:[#allocation5 + $0x1e4] ss:$12 sps:$4 sm:$0xff]  }
  0x4f   :  { %512 = vmatprep.subr.bf16.mxu0 %v1814_v28  ;;  %1643 = vmatpush3.bf16.msra.mxu1 %v1836_v57 }
  0x50   :  { %1644 = vmatprep.subr.bf16.mxu1 %v1987_v43 }
  0x52   :  { %513 = vmatpush1.bf16.msra.mxu0 %v1812_v29 }
  0x53   :  { %514 = vmatprep.subr.bf16.mxu0 %v1817_v30  ;;  %1645 = vmatpush3.bf16.msra.mxu1 %v1837_v58  ;;  %v1862_v30 = vld [vmem:[#allocation5 + $0x1e0] ss:$12 sps:$4 sm:$0xff]  }
  0x54   :  { %1650 = vmatprep.subr.bf16.mxu1 %v1987_v43 }
  0x56   :  { %515 = vmatpush1.bf16.msra.mxu0 %v1815_v31  ;;  %1647 = vmatmul.mubr.bf16.vlgmr.msra.gmra.mrb[0].mxu1 %v2079_v25  ;;  %v1860_v25 = vld [vmem:[#allocation5 + $0x1cc] ss:$12 sps:$4 sm:$0xff]  }
  0x57   :  { %516 = vmatprep.subr.bf16.mxu0 %v1820_v32  ;;  %1651 = vmatpush3.bf16.msra.mxu1 %v1838_v59 }
  0x58   :  { %1666 = vmatprep.mubr.msk.bf16.mxu1 %vm1988_vm3, %v1987_v43  ;;  %1652 = vmatprep.subr.bf16.mxu1 %v1987_v43 }
  0x5a   :  { %517 = vmatpush1.bf16.msra.mxu0 %v1818_v33  ;;  %v1868_v33 = vld [vmem:[#allocation5 + $0x1fc] ss:$12 sps:$4 sm:$0xff]  }
  0x5b   :  { %518 = vmatprep.subr.bf16.mxu0 %v1823_v34  ;;  %1653 = vmatpush3.bf16.msra.mxu1 %v1839_v60  ;;  %v1866_v34 = vld [vmem:[#allocation5 + $0x1f8] ss:$12 sps:$4 sm:$0xff]  }
  0x5c   :  { %1654 = vmatprep.subr.bf16.mxu1 %v1987_v43 }
  0x5e   :  { %519 = vmatpush1.bf16.msra.mxu0 %v1821_v35  ;;  %v1872_v35 = vld [vmem:[#allocation5 + $0x214] ss:$12 sps:$4 sm:$0xff]  }
  0x5f   :  { %520 = vmatprep.subr.bf16.mxu0 %v1826_v36  ;;  %1655 = vmatpush3.bf16.msra.mxu1 %v1840_v61  ;;  %v1870_v36 = vld [vmem:[#allocation5 + $0x210] ss:$12 sps:$4 sm:$0xff]   ;;  %v1849_v61 = vld [vmem:[#allocation5 + $0x188] ss:$12 sps:$4 sm:$0xff]  }
  0x60   :  { %1656 = vmatprep.subr.bf16.mxu1 %v1987_v43 }
  0x62   :  { %521 = vmatpush1.bf16.msra.mxu0 %v1824_v37 }
  0x63   :  { %522 = vmatprep.subr.bf16.mxu0 %v1829_v38  ;;  %1657 = vmatpush3.bf16.msra.mxu1 %v1841_v62  ;;  %v84_v38 = vshrl.u32 %v51_v44, 7  ;;  %v1853_v62 = vld [vmem:[#allocation5 + $0x1a0] ss:$12 sps:$4 sm:$0xff]  }
  0x64   :  { %1658 = vmatprep.subr.bf16.mxu1 %v1987_v43 }
  0x65   :  { %vm91_vm6 = vcmp.eq.s32.totalorder %v84_v38, %v1462_v52 }
  0x66   :  { %523 = vmatpush1.bf16.msra.mxu0 %v1827_v39  ;;  %v1463_v57 = vsel %vm91_vm6, 1.0, %v1987_v43 }
  0x67   :  { %1659 = vmatpush3.bf16.msra.mxu1 %v1842_v63  ;;  %v1857_v63 = vld [vmem:[#allocation5 + $0x1b8] ss:$12 sps:$4 sm:$0xff]  }
  0x68   :  { %1660 = vmatprep.subr.bf16.mxu1 %v1987_v43 }
  0x69   :  { %541 = vmatmul.mubr.bf16.vlgmr.msra.gmra.mrb[4].mxu0 %v2089_v42 }
  0x6b   :  { %1661 = vmatpush3.bf16.msra.mxu1 %v1843_v1  ;;  %v1861_v1 = vld [vmem:[#allocation5 + $0x1d0] ss:$12 sps:$4 sm:$0xff]  }
  0x6c   :  { %1662 = vmatprep.subr.bf16.mxu1 %v1987_v43 }
  0x6f   :  { %1663 = vmatpush3.bf16.msra.mxu1 %v1844_v2  ;;  %v1865_v2 = vld [vmem:[#allocation5 + $0x1e8] ss:$12 sps:$4 sm:$0xff]  }
  0x70   :  { %1664 = vmatprep.subr.bf16.mxu1 %v1987_v43 }
  0x73   :  { %1665 = vmatpush3.bf16.msra.mxu1 %v1845_v18 }
  0x74   :  { %1678 = vmatprep.subr.bf16.mxu1 %v1987_v43 }
  0x76   :  { %1667 = vmatmul.mubr.bf16.vlgmr.msra.gmra.mrb[4].mxu1 %v2089_v42  ;;  %v1516_v42 = vld [vmem:[%s2236_s5] ss:$0 sm:$0xff] }
  0x77   :  { %1680 = vmatprep.mubr.msk.bf16.mxu1 %vm1988_vm3, %v1987_v43 }
  0xa9   :  { %v59_v46 = vpop.permute.xlu0 %58 }
  0xaa   :  { %vm69_vm0 = vcmp.eq.s32.totalorder %v2094_v45, %v59_v46 }
  0xab   :  { %v1458_v47 = vsel %vm69_vm0, 1.0, %v1987_v43 }
  0xad   :  { %v65_v7 = vpop.permute.xlu1 %64 }
  0xae   :  { %v62_v48 = vpop.permute.xlu0 %61  ;;  %vm71_vm4 = vcmp.eq.s32.totalorder %v2094_v45, %v65_v7  ;;  %v1876_v7 = vld [vmem:[#allocation5 + $0x22c] ss:$12 sps:$4 sm:$0xff]  }
  0xaf   :  { %vm70_vm1 = vcmp.eq.s32.totalorder %v2094_v45, %v62_v48  ;;  %v1460_v15 = vsel %vm71_vm4, 1.0, %v1987_v43  ;;  %v85_v48 = vadd.s32 8, %v84_v38  ;;  %v1904_v38 = vld [vmem:[#allocation5 + $0x2d4] ss:$12 sps:$4 sm:$0xff]  }
  0xb0   :  { %v1459_v49 = vsel %vm70_vm1, 1.0, %v1987_v43 }
  0xb1   :  { %v2100_v50 = vpack.c.bf16 %v1459_v49, %v1458_v47  ;;  %v68_v11 = vpop.permute.xlu1 %67  ;;  %vm92_vm7 = vcmp.eq.s32.totalorder %v85_v48, %v1462_v52 }
  0xb2   :  { %vm72_vm5 = vcmp.eq.s32.totalorder %v2094_v45, %v68_v11  ;;  %v1464_v58 = vsel %vm92_vm7, 1.0, %v1987_v43 }
  0xb3   :  { %1674 = vmatprep.mubr.msk.bf16.mxu0 %vm601_vm2, %v2100_v50  ;;  %v1461_v16 = vsel %vm72_vm5, 1.0, %v1987_v43  ;;  %v2157_v60 = vpack.c.bf16 %v1464_v58, %v1463_v57  ;;  %v1881_v58 = vld [vmem:[#allocation5 + $0x248] ss:$12 sps:$4 sm:$0xff]  }
  0xb4   :  { %v2136_v17 = vpack.c.bf16 %v1461_v16, %v1460_v15 }
 0x11c   :  { %v2124_v3 = vpop.f32.mrb[0].mxu0 }
 0x11d   :  { %v2126_v4 = vpop.f32.mrb[1].mxu0 }
 0x11e   :  { %v2128_v5 = vpop.f32.mrb[2].mxu0 }
 0x11f   :  { %v2130_v6 = vpop.f32.mrb[3].mxu0 }
 0x129   :  { %v2145_v28 = vpop.f32.mrb[0].mxu1 }
 0x12a   :  { %v1648_v29 = vpop.f32.mrb[1].mxu1 }
 0x12b   :  { %v2147_v31 = vpop.f32.mrb[2].mxu1  ;;  %v1882_v29 = vld [vmem:[#allocation5 + $0x258] ss:$12 sps:$4 sm:$0xff]  }
 0x12c   :  { %v1649_v32 = vpop.f32.mrb[3].mxu1 }
 0x12d   :  { %v1886_v32 = vld [vmem:[#allocation5 + $0x270] ss:$12 sps:$4 sm:$0xff]  }
 0x13c   :  { %v542_v8 = vpop.f32.mrb[4].mxu0 }
 0x13d   :  { %v544_v9 = vpop.f32.mrb[5].mxu0 }
 0x13e   :  { %v546_v10 = vpop.f32.mrb[6].mxu0 }
 0x13f   :  { %v599_v12 = vpack.c.bf16 %v546_v10, %v542_v8  ;;  %v548_v13 = vpop.f32.mrb[7].mxu0  ;;  %v1874_v8 = vld [vmem:[#allocation5 + $0x228] ss:$12 sps:$4 sm:$0xff]   ;;  %v1513_v10 = vld [vmem:[%s2236_s5 + $0x3] ss:$0 sm:$0xff] }
 0x140   :  { %v600_v14 = vpack.c.bf16 %v548_v13, %v544_v9  ;;  %v1877_v9 = vld [vmem:[#allocation5 + $0x230] ss:$12 sps:$4 sm:$0xff]  }
 0x141   :  { %1670 = vmatprep.subr.bf16.mxu0 %v599_v12 }
 0x142   :  { %1671 = vmatpush3.bf16.msra.mxu0 %v599_v12 }
 0x143   :  { %1672 = vmatprep.subr.bf16.mxu0 %v600_v14 }
 0x146   :  { %1673 = vmatpush3.bf16.msra.mxu0 %v600_v14 }
 0x147   :  { %879 = vmatprep.subr.bf16.mxu0 %v1848_v20 }
 0x149   :  { %1675 = vmatmul.mubr.msk.bf16.vlgmr.msra.gmra.mrb[8].mxu0 %vm601_vm2, %v2136_v17 }
 0x14a   :  { %911 = vmatprep.mubr.bf16.mxu0 %v1986_v0  ;;  %880 = vmatpush1.bf16.msra.mxu0 %v1846_v19 }
 0x14b   :  { %881 = vmatprep.subr.bf16.mxu0 %v1852_v21 }
 0x14e   :  { %882 = vmatpush1.bf16.msra.mxu0 %v1850_v22 }
 0x14f   :  { %883 = vmatprep.subr.bf16.mxu0 %v1856_v23 }
 0x152   :  { %884 = vmatpush1.bf16.msra.mxu0 %v1854_v24 }
 0x153   :  { %885 = vmatprep.subr.bf16.mxu0 %v1860_v25  ;;  %v1878_v25 = vld [vmem:[#allocation5 + $0x240] ss:$12 sps:$4 sm:$0xff]  }
 0x156   :  { %886 = vmatpush1.bf16.msra.mxu0 %v1858_v26  ;;  %v1880_v26 = vld [vmem:[#allocation5 + $0x244] ss:$12 sps:$4 sm:$0xff]  }
 0x157   :  { %887 = vmatprep.subr.bf16.mxu0 %v1864_v27  ;;  %v1884_v27 = vld [vmem:[#allocation5 + $0x25c] ss:$12 sps:$4 sm:$0xff]  }
 0x15a   :  { %888 = vmatpush1.bf16.msra.mxu0 %v1862_v30  ;;  %v1888_v30 = vld [vmem:[#allocation5 + $0x274] ss:$12 sps:$4 sm:$0xff]  }
 0x15b   :  { %889 = vmatprep.subr.bf16.mxu0 %v1868_v33  ;;  %v1892_v33 = vld [vmem:[#allocation5 + $0x28c] ss:$12 sps:$4 sm:$0xff]  }
 0x15e   :  { %890 = vmatpush1.bf16.msra.mxu0 %v1866_v34  ;;  %v1890_v34 = vld [vmem:[#allocation5 + $0x288] ss:$12 sps:$4 sm:$0xff]  }
 0x15f   :  { %891 = vmatprep.subr.bf16.mxu0 %v1872_v35  ;;  %v1896_v35 = vld [vmem:[#allocation5 + $0x2a4] ss:$12 sps:$4 sm:$0xff]  }
 0x162   :  { %892 = vmatpush1.bf16.msra.mxu0 %v1870_v36  ;;  %v1894_v36 = vld [vmem:[#allocation5 + $0x2a0] ss:$12 sps:$4 sm:$0xff]  }
 0x163   :  { %893 = vmatprep.subr.bf16.mxu0 %v1876_v7 }
 0x166   :  { %894 = vmatpush1.bf16.msra.mxu0 %v1874_v8 }
 0x21c   :  { %v1676_v37 = vpop.f32.mrb[8].mxu0 }
 0x21d   :  { %v642_v39 = vpop.f32.mrb[9].mxu0 }
 0x21e   :  { %v657_v40 = vadd.f32 %v1676_v37, %v642_v39  ;;  %v1677_v41 = vpop.f32.mrb[10].mxu0  ;;  %v1898_v37 = vld [vmem:[#allocation5 + $0x2b8] ss:$12 sps:$4 sm:$0xff]   ;;  %v1902_v39 = vld [vmem:[#allocation5 + $0x2d0] ss:$12 sps:$4 sm:$0xff]  }
 0x21f   :  { %v645_v45 = vpop.f32.mrb[11].mxu0 }
 0x220   :  { %v659_v46 = vadd.f32 %v657_v40, %v2124_v3  ;;  %v658_v47 = vadd.f32 %v1677_v41, %v645_v45  ;;  %v1869_v3 = vld [vmem:[#allocation5 + $0x200] ss:$12 sps:$4 sm:$0xff]  }
 0x222   :  { %v666_v49 = vadd.f32 %v1516_v42, %v659_v46  ;;  %v660_v51 = vadd.f32 %v658_v47, %v2128_v5  ;;  %v1873_v5 = vld [vmem:[#allocation5 + $0x218] ss:$12 sps:$4 sm:$0xff]   ;;  %v1545_v46 = vld [vmem:[%s2236_s5 + $0x1] ss:$0 sm:$0xff] }
 0x224   :  { %v668_v53 = vmul.f32 0.01, %v666_v49  ;;  %v667_v54 = vadd.f32 %v1516_v42, %v660_v51 }
 0x226   :  { %v669_v44 = vmul.f32 0.01, %v667_v54  ;;  %v670_v55 = vmax.f32 %v666_v49, %v668_v53 }
 0x228   :  { %v671_v56 = vmax.f32 %v667_v54, %v669_v44 }
 0x22a   :  { %v672_v59 = vpack.c.bf16 %v671_v56, %v670_v55 }
 0x22c   :  { %1679 = vmatpush3.bf16.msra.mxu1 %v672_v59  ;;  %v1885_v59 = vld [vmem:[#allocation5 + $0x260] ss:$12 sps:$4 sm:$0xff]  }
 0x22d   :  { %1684 = vmatprep.subr.bf16.mxu1 %v1987_v43 }
 0x22f   :  { %1681 = vmatmul.mubr.msk.bf16.vlgmr.msra.gmra.mrb[4].mxu1 %vm673_vm8, %v2157_v60 }
 0x230   :  { %1685 = vmatpush3.bf16.msra.mxu1 %v1849_v61  ;;  %1700 = vmatprep.mubr.msk.bf16.mxu1 %vm1988_vm3, %v1987_v43  ;;  %v1897_v61 = vld [vmem:[#allocation5 + $0x2a8] ss:$12 sps:$4 sm:$0xff]  }
 0x231   :  { %1686 = vmatprep.subr.bf16.mxu1 %v1987_v43 }
 0x234   :  { %1687 = vmatpush3.bf16.msra.mxu1 %v1853_v62  ;;  %v1901_v62 = vld [vmem:[#allocation5 + $0x2c0] ss:$12 sps:$4 sm:$0xff]  }
 0x235   :  { %1688 = vmatprep.subr.bf16.mxu1 %v1987_v43 }
 0x238   :  { %1689 = vmatpush3.bf16.msra.mxu1 %v1857_v63  ;;  %v1905_v63 = vld [vmem:[#allocation5 + $0x2d8] ss:$12 sps:$4 sm:$0xff]  }
 0x239   :  { %1690 = vmatprep.subr.bf16.mxu1 %v1987_v43 }
 0x23c   :  { %1691 = vmatpush3.bf16.msra.mxu1 %v1861_v1  ;;  %v1908_v1 = vld [vmem:[#allocation5 + $0x2ec] ss:$12 sps:$4 sm:$0xff]  }
 0x23d   :  { %1692 = vmatprep.subr.bf16.mxu1 %v1987_v43 }
 0x240   :  { %1693 = vmatpush3.bf16.msra.mxu1 %v1865_v2  ;;  %v1906_v2 = vld [vmem:[#allocation5 + $0x2e8] ss:$12 sps:$4 sm:$0xff]  }
 0x241   :  { %1694 = vmatprep.subr.bf16.mxu1 %v1987_v43 }
 0x244   :  { %1695 = vmatpush3.bf16.msra.mxu1 %v1869_v3  ;;  %v1909_v3 = vld [vmem:[#allocation5 + $0x2f0] ss:$12 sps:$4 sm:$0xff]  }
 0x245   :  { %1696 = vmatprep.subr.bf16.mxu1 %v1987_v43 }
 0x248   :  { %1697 = vmatpush3.bf16.msra.mxu1 %v1873_v5  ;;  %v1542_v5 = vld [vmem:[%s2236_s5 + $0x4] ss:$0 sm:$0xff] }
 0x249   :  { %1698 = vmatprep.subr.bf16.mxu1 %v1987_v43 }
 0x24c   :  { %1699 = vmatpush3.bf16.msra.mxu1 %v1877_v9 }
 0x24d   :  { %1712 = vmatprep.subr.bf16.mxu1 %v1987_v43 }
 0x302   :  { %v711_v11 = vpop.f32.mrb[4].mxu1 }
 0x303   :  { %v1682_v12 = vpop.f32.mrb[5].mxu1  ;;  %v1752_v14 = vadd.f32 %v1513_v10, %v711_v11 }
 0x304   :  { %v714_v13 = vpop.f32.mrb[6].mxu1 }
 0x305   :  { %v1753_v15 = vadd.f32 %v1513_v10, %v714_v13  ;;  %v1683_v16 = vpop.f32.mrb[7].mxu1 }
 0x307   :  { %v718_v18 = vpack.c.bf16 %v1753_v15, %v1752_v14 }
 0x309   :  { %912 = vmatmul.mubr.bf16.vlgmr.msra.gmra.mrb[12].mxu0 %v718_v18  ;;  %1701 = vmatmul.mubr.bf16.vlgmr.msra.gmra.mrb[8].mxu1 %v718_v18 }
 0x30a   :  { %1708 = vmatprep.mubr.msk.bf16.mxu0 %vm601_vm2, %v2100_v50  ;;  %1714 = vmatprep.mubr.msk.bf16.mxu1 %vm1988_vm3, %v1987_v43 }
 0x3dc   :  { %v913_v19 = vpop.f32.mrb[12].mxu0 }
 0x3dd   :  { %v915_v20 = vpop.f32.mrb[13].mxu0 }
 0x3de   :  { %v917_v21 = vpop.f32.mrb[14].mxu0 }
 0x3df   :  { %v970_v22 = vpack.c.bf16 %v917_v21, %v913_v19  ;;  %v919_v23 = vpop.f32.mrb[15].mxu0 }
 0x3e0   :  { %v971_v24 = vpack.c.bf16 %v919_v23, %v915_v20 }
 0x3e1   :  { %1704 = vmatprep.subr.bf16.mxu0 %v970_v22 }
 0x3e2   :  { %1705 = vmatpush3.bf16.msra.mxu0 %v970_v22 }
 0x3e3   :  { %1706 = vmatprep.subr.bf16.mxu0 %v971_v24 }
 0x3e6   :  { %1707 = vmatpush3.bf16.msra.mxu0 %v971_v24 }
 0x3e7   :  { %1239 = vmatprep.subr.bf16.mxu0 %v1880_v26 }
 0x3e9   :  { %1709 = vmatmul.mubr.msk.bf16.vlgmr.msra.gmra.mrb[16].mxu0 %vm601_vm2, %v2136_v17 }
 0x3ea   :  { %1271 = vmatprep.mubr.bf16.mxu0 %v1986_v0  ;;  %1240 = vmatpush1.bf16.msra.mxu0 %v1878_v25  ;;  %v1900_v0 = vld [vmem:[#allocation5 + $0x2bc] ss:$12 sps:$4 sm:$0xff]  }
 0x3eb   :  { %1241 = vmatprep.subr.bf16.mxu0 %v1884_v27 }
 0x3ee   :  { %1242 = vmatpush1.bf16.msra.mxu0 %v1882_v29 }
 0x3ef   :  { %1243 = vmatprep.subr.bf16.mxu0 %v1888_v30 }
 0x3f2   :  { %1244 = vmatpush1.bf16.msra.mxu0 %v1886_v32 }
 0x3f3   :  { %1245 = vmatprep.subr.bf16.mxu0 %v1892_v33 }
 0x3f6   :  { %1246 = vmatpush1.bf16.msra.mxu0 %v1890_v34 }
 0x3f7   :  { %1247 = vmatprep.subr.bf16.mxu0 %v1896_v35 }
 0x3fa   :  { %1248 = vmatpush1.bf16.msra.mxu0 %v1894_v36  ;;  %v1571_v36 = vld [vmem:[%s2236_s5 + $0x5] ss:$0 sm:$0xff] }
 0x3fb   :  { %1249 = vmatprep.subr.bf16.mxu0 %v1900_v0 }
 0x3fe   :  { %1250 = vmatpush1.bf16.msra.mxu0 %v1898_v37 }
 0x3ff   :  { %1251 = vmatprep.subr.bf16.mxu0 %v1904_v38 }
 0x402   :  { %1252 = vmatpush1.bf16.msra.mxu0 %v1902_v39 }
 0x403   :  { %1253 = vmatprep.subr.bf16.mxu0 %v1908_v1 }
 0x406   :  { %1254 = vmatpush1.bf16.msra.mxu0 %v1906_v2 }
 0x4bc   :  { %v1710_v40 = vpop.f32.mrb[16].mxu0 }
 0x4bd   :  { %v1006_v41 = vpop.f32.mrb[17].mxu0 }
 0x4be   :  { %v1021_v42 = vadd.f32 %v1710_v40, %v1006_v41  ;;  %v1711_v45 = vpop.f32.mrb[18].mxu0 }
 0x4bf   :  { %v1009_v47 = vpop.f32.mrb[19].mxu0 }
 0x4c0   :  { %v1023_v48 = vadd.f32 %v1021_v42, %v2126_v4  ;;  %v1022_v49 = vadd.f32 %v1711_v45, %v1009_v47  ;;  %v1889_v4 = vld [vmem:[#allocation5 + $0x278] ss:$12 sps:$4 sm:$0xff]  }
 0x4c2   :  { %v1030_v51 = vadd.f32 %v1545_v46, %v1023_v48  ;;  %v1024_v52 = vadd.f32 %v1022_v49, %v2130_v6  ;;  %v1893_v6 = vld [vmem:[#allocation5 + $0x290] ss:$12 sps:$4 sm:$0xff]  }
 0x4c4   :  { %v1032_v53 = vmul.f32 0.01, %v1030_v51  ;;  %v1031_v54 = vadd.f32 %v1545_v46, %v1024_v52 }
 0x4c6   :  { %v1033_v44 = vmul.f32 0.01, %v1031_v54  ;;  %v1034_v55 = vmax.f32 %v1030_v51, %v1032_v53 }
 0x4c8   :  { %v1035_v56 = vmax.f32 %v1031_v54, %v1033_v44 }
 0x4ca   :  { %v1036_v57 = vpack.c.bf16 %v1035_v56, %v1034_v55 }
 0x4cc   :  { %1713 = vmatpush3.bf16.msra.mxu1 %v1036_v57 }
 0x4cd   :  { %1718 = vmatprep.subr.bf16.mxu1 %v1987_v43 }
 0x4cf   :  { %1715 = vmatmul.mubr.msk.bf16.vlgmr.msra.gmra.mrb[8].mxu1 %vm673_vm8, %v2157_v60 }
 0x4d0   :  { %1719 = vmatpush3.bf16.msra.mxu1 %v1881_v58  ;;  %1734 = vmatprep.mubr.msk.bf16.mxu1 %vm1988_vm3, %v1987_v43 }
 0x4d1   :  { %1720 = vmatprep.subr.bf16.mxu1 %v1987_v43 }
 0x4d4   :  { %1721 = vmatpush3.bf16.msra.mxu1 %v1885_v59 }
 0x4d5   :  { %1722 = vmatprep.subr.bf16.mxu1 %v1987_v43 }
 0x4d8   :  { %1723 = vmatpush3.bf16.msra.mxu1 %v1889_v4 }
 0x4d9   :  { %1724 = vmatprep.subr.bf16.mxu1 %v1987_v43 }
 0x4dc   :  { %1725 = vmatpush3.bf16.msra.mxu1 %v1893_v6 }
 0x4dd   :  { %1726 = vmatprep.subr.bf16.mxu1 %v1987_v43 }
 0x4e0   :  { %1727 = vmatpush3.bf16.msra.mxu1 %v1897_v61 }
 0x4e1   :  { %1728 = vmatprep.subr.bf16.mxu1 %v1987_v43 }
 0x4e4   :  { %1729 = vmatpush3.bf16.msra.mxu1 %v1901_v62 }
 0x4e5   :  { %1730 = vmatprep.subr.bf16.mxu1 %v1987_v43 }
 0x4e8   :  { %1731 = vmatpush3.bf16.msra.mxu1 %v1905_v63 }
 0x4e9   :  { %1732 = vmatprep.subr.bf16.mxu1 %v1987_v43 }
 0x4ec   :  { %1733 = vmatpush3.bf16.msra.mxu1 %v1909_v3 }
 0x4ed   :  { %1746 = vmatprep.subr.bf16.mxu1 %v1987_v43 }
 0x5a2   :  { %v1071_v7 = vpop.f32.mrb[8].mxu1 }
 0x5a3   :  { %v1716_v8 = vpop.f32.mrb[9].mxu1  ;;  %v1754_v10 = vadd.f32 %v1542_v5, %v1071_v7 }
 0x5a4   :  { %v1074_v9 = vpop.f32.mrb[10].mxu1 }
 0x5a5   :  { %v1755_v11 = vadd.f32 %v1542_v5, %v1074_v9  ;;  %v1717_v12 = vpop.f32.mrb[11].mxu1 }
 0x5a7   :  { %v1078_v13 = vpack.c.bf16 %v1755_v11, %v1754_v10 }
 0x5a9   :  { %1272 = vmatmul.mubr.bf16.vlgmr.msra.gmra.mrb[20].mxu0 %v1078_v13  ;;  %1735 = vmatmul.mubr.bf16.vlgmr.msra.gmra.mrb[12].mxu1 %v1078_v13 }
 0x5aa   :  { %1742 = vmatprep.mubr.msk.bf16.mxu0 %vm601_vm2, %v2100_v50  ;;  %1748 = vmatprep.mubr.msk.bf16.mxu1 %vm1988_vm3, %v1987_v43  ;;  %v1574_v43 = vld [vmem:[%s2236_s5 + $0x2] ss:$0 sm:$0xff] }
 0x67c   :  { %v1273_v14 = vpop.f32.mrb[20].mxu0 }
 0x67d   :  { %v1275_v15 = vpop.f32.mrb[21].mxu0 }
 0x67e   :  { %v1277_v16 = vpop.f32.mrb[22].mxu0 }
 0x67f   :  { %v1330_v18 = vpack.c.bf16 %v1277_v16, %v1273_v14  ;;  %v1279_v19 = vpop.f32.mrb[23].mxu0 }
 0x680   :  { %v1331_v20 = vpack.c.bf16 %v1279_v19, %v1275_v15 }
 0x681   :  { %1738 = vmatprep.subr.bf16.mxu0 %v1330_v18 }
 0x682   :  { %1739 = vmatpush3.bf16.msra.mxu0 %v1330_v18 }
 0x683   :  { %1740 = vmatprep.subr.bf16.mxu0 %v1331_v20 }
 0x686   :  { %1741 = vmatpush3.bf16.msra.mxu0 %v1331_v20 }
 0x689   :  { %1743 = vmatmul.mubr.msk.bf16.vlgmr.msra.gmra.mrb[24].mxu0 %vm601_vm2, %v2136_v17 }
 0x75c   :  { %v1744_v21 = vpop.f32.mrb[24].mxu0 }
 0x75d   :  { %v1366_v22 = vpop.f32.mrb[25].mxu0 }
 0x75e   :  { %v1381_v23 = vadd.f32 %v1744_v21, %v1366_v22  ;;  %v1745_v50 = vpop.f32.mrb[26].mxu0 }
 0x75f   :  { %v1369_v24 = vpop.f32.mrb[27].mxu0 }
 0x760   :  { %v1383_v25 = vadd.f32 %v1381_v23, %v2145_v28  ;;  %v1382_v26 = vadd.f32 %v1745_v50, %v1369_v24 }
 0x762   :  { %v1390_v27 = vadd.f32 %v1574_v43, %v1383_v25  ;;  %v1384_v29 = vadd.f32 %v1382_v26, %v2147_v31 }
 0x764   :  { %v1392_v30 = vmul.f32 0.01, %v1390_v27  ;;  %v1391_v32 = vadd.f32 %v1574_v43, %v1384_v29 }
 0x766   :  { %v1393_v33 = vmul.f32 0.01, %v1391_v32  ;;  %v1394_v34 = vmax.f32 %v1390_v27, %v1392_v30 }
 0x768   :  { %v1395_v17 = vmax.f32 %v1391_v32, %v1393_v33 }
 0x76a   :  { %v1396_v35 = vpack.c.bf16 %v1395_v17, %v1394_v34 }
 0x76c   :  { %1747 = vmatpush3.bf16.msra.mxu1 %v1396_v35 }
 0x76f   :  { %1749 = vmatmul.mubr.msk.bf16.vlgmr.msra.gmra.mrb[12].mxu1 %vm673_vm8, %v2157_v60 }
 0x842   :  { %v1431_v28 = vpop.f32.mrb[12].mxu1 }
 0x843   :  { %v1756_v0 = vadd.f32 %v1571_v36, %v1431_v28  ;;  %v1750_v37 = vpop.f32.mrb[13].mxu1 }
 0x844   :  { %v1434_v31 = vpop.f32.mrb[14].mxu1 }
 0x845   :  { %1438 = vst [vmem:[#allocation7] sm:$0xff] %v1756_v0  ;;  %v1757_v38 = vadd.f32 %v1571_v36, %v1434_v31  ;;  %v1751_v39 = vpop.f32.mrb[15].mxu1 }
 0x847   :  { %1439 = vst [vmem:[#allocation7 + $0x8] sm:$0xff] %v1757_v38 }
 0x848   :  { %1965 = shalt.err (!%p1962_p6)
}
 0x849   :  { %s1966_s25 = scalar_lea.hbm %s2237_s6, 256 }
 0x84a   :  { %p1967_p7 = scmp.ne.s32.totalorder %s2237_s6, %s1966_s25  ;;  %p1970_p8 = scmp.lt.u32.totalorder %s1966_s25, %s2237_s6 }
 0x84c   :  { %p1972_p9 = pnand %p1970_p8, %p1967_p7 }
 0x84e   :  { %1975 = shalt.err (!%p1972_p9)
}
 0x84f   :  { %s1990_s30 = smov 128   ;;  %s1991_s7 = smov 8  }
 0x850   :  { %1451 = dma.vmem_to_hbm [thread:$0]  %s1446_s4, 256, %s2237_s6, [#allocation4], %s1990_s30, %s1990_s30, %s1991_s7  }
 0x851   :  { %1980 = dma.done.wait [#allocation4], 256  }
 0x852   :  { %1981 = vsyncadd [#allocation4], 4294967040 }
 0x853   :  { %1455 = vsyncpa [#allocation3], 1 }
 0x854   :  { %1456 = vsyncpa [#allocation6], 1 }
 0x855   :  { %1457 = vsyncpa [#allocation4], 1 }

</bundles_post_ra>
